<compile_context>
chip_gen: v5e
topology: v5e:2x2
jax: 0.10.0
libtpu: 0.0.40
codegen_flags: <defaults>
</compile_context>

<pallas_src>
import functools

import jax
import jax.numpy as jnp
from jax import lax
from jax.experimental import pallas as pl
from jax.experimental.pallas import tpu as pltpu

_LANE = 128
_T_CAP = 8192      # lane-axis tile cap; HBM-roofline plateau is reached well below this
_VPU_BUDGET = 64   # use the exact VPU multiply-add path when C_in * padded(C_out) <= this


def _round_up(v, m):
    return -(-v // m) * m


def _sublane_pad(c, itemsize):
    # Minimal sublane granule: 8 rows (f32), 16 (bf16), 32 (int8).
    return _round_up(c, max(8, 32 // itemsize))


def _use_vpu_path(c_in, c_out, itemsize):
    return c_in * _sublane_pad(c_out, itemsize) <= _VPU_BUDGET


def _pick_tiles(n, hw, c_in, c_out, itemsize, vmem_budget_bytes, use_vpu):
    """Pick (nb, t, vmem_limit_bytes): batch tile, lane tile and scoped-VMEM limit."""
    c_in_p = _sublane_pad(c_in, itemsize)
    c_out_p = _sublane_pad(c_out, itemsize)

    # Batch several images per grid step when the feature map is small, so we
    # are not dominated by the ~0.35 us fixed per-step overhead.
    nb = min(8, n) if (hw <= 4096 and n > 1) else 1

    # Resident weight/bias footprint (double-buffered, sublane/lane padded).
    if use_vpu:
        w_tile = c_in * c_out_p * _LANE                # (C_in, C_out, 1) layout
    else:
        w_tile = c_out_p * _round_up(c_in, _LANE)      # (C_out, C_in) layout
    fixed = 2 * (w_tile + c_out_p * _LANE) * itemsize

    if hw <= _LANE:
        t = hw  # block dim equal to the full array dim is always legal
    else:
        # Double-buffered, sublane-PADDED x and out blocks must fit the budget.
        per_col = 2 * nb * (c_in_p + c_out_p) * itemsize
        cols = (vmem_budget_bytes - fixed) // per_col
        t = max(_LANE, (cols // _LANE) * _LANE)
        t = min(t, _T_CAP)
        # Keep a handful of grid steps so megacore / dual-TC both get work.
        n_steps = -(-n // nb)
        min_hw_tiles = max(1, 8 // n_steps)
        t_bal = _round_up(-(-hw // min_hw_tiles), _LANE)
        t = min(t, max(_LANE, t_bal))

    # Scoped-VMEM limit derived from the actual padded footprint (+25% and a
    # 2 MiB slack for compiler scratch).  Always >= the real need, always far
    # below v7x's 64 MiB physical VMEM with the t cap above.
    need = fixed + 2 * nb * (c_in_p + c_out_p) * t * itemsize
    vmem_limit = max(4 << 20, int(need * 1.25) + (2 << 20))
    return nb, t, vmem_limit


def _outconv_kernel(x_ref, w_ref, b_ref, o_ref, *, use_vpu):
    # x_ref: (nb, C_in, T)    o_ref: (nb, C_out, T)    b_ref: (C_out, 1)
    # w_ref: (C_in, C_out, 1) on the VPU path, (C_out, C_in) on the MXU path.
    nb, c_in, _ = x_ref.shape
    b = b_ref[...].astype(jnp.float32)                       # (C_out, 1)
    if use_vpu:
        # Exact f32 multiply-add over the tiny C_in axis on the VPU.  No MXU
        # passes at all (Precision.HIGHEST would have cost ~6 bf16 passes).
        w = w_ref[...].astype(jnp.float32)                   # (C_in, C_out, 1)
        for bi in range(nb):
            xb = x_ref[bi].astype(jnp.float32)               # (C_in, T)
            acc = b                                          # broadcasts up to (C_out, T)
            for ci in range(c_in):
                acc = acc + w[ci] * xb[ci:ci + 1, :]         # (C_out,1)*(1,T) -> (C_out,T)
            o_ref[bi] = acc.astype(o_ref.dtype)
    else:
        # Default-precision MXU dot with f32 accumulate (mem-bound op; HIGHEST
        # would multiply the vmatmul pushes ~6x for no roofline benefit).
        w = w_ref[...]                                       # (C_out, C_in)
        for bi in range(nb):
            acc = jnp.dot(w, x_ref[bi], preferred_element_type=jnp.float32)
            o_ref[bi] = (acc + b).astype(o_ref.dtype)


def outconv_forward(x_nchw, weight, bias, *, vmem_budget_bytes=24 * 1024 * 1024):
    """1x1 conv forward (OutConv).

    x_nchw : (N, C_in, H, W)
    weight : (C_out, C_in, 1, 1) or (C_out, C_in)
    bias   : (C_out,)
    returns (N, C_out, H, W)
    """
    N, C_in, H, W = x_nchw.shape
    C_out = weight.shape[0]
    HW = H * W
    itemsize = x_nchw.dtype.itemsize

    # Free reshapes only (NCHW-native; no transposes, no extra HBM traffic).
    x = x_nchw.reshape(N, C_in, HW)
    w2d = weight.reshape(C_out, C_in).astype(x.dtype)
    b = bias.reshape(C_out, 1).astype(x.dtype)

    use_vpu = _use_vpu_path(C_in, C_out, itemsize)
    nb, t, vmem_limit = _pick_tiles(N, HW, C_in, C_out, itemsize,
                                    vmem_budget_bytes, use_vpu)

    if use_vpu:
        # (C_in, C_out, 1): each w[ci] slice is already sublane=C_out and
        # lane-broadcastable — the natural layout for the VPU FMA loop.
        wk = w2d.T.reshape(C_in, C_out, 1)
        w_spec = pl.BlockSpec((C_in, C_out, 1), lambda i, j: (0, 0, 0))
    else:
        wk = w2d
        w_spec = pl.BlockSpec((C_out, C_in), lambda i, j: (0, 0))

    grid = (pl.cdiv(N, nb), pl.cdiv(HW, t))

    out = pl.pallas_call(
        functools.partial(_outconv_kernel, use_vpu=use_vpu),
        out_shape=jax.ShapeDtypeStruct((N, C_out, HW), x.dtype),
        grid_spec=pltpu.PrefetchScalarGridSpec(
            num_scalar_prefetch=0,
            grid=grid,
            in_specs=[
                # x: (nb, C_in, t) slab, lane-dense along H*W.
                # TODO(synk): sweep pipeline_mode=pl.Buffered(3) here on v7x.
                pl.BlockSpec((nb, C_in, t), lambda i, j: (i, 0, j)),
                # weight / bias: tiny constant blocks, resident every step.
                w_spec,
                pl.BlockSpec((C_out, 1), lambda i, j: (0, 0)),
            ],
            # Output block is lane-dense along H*W (last dim = t).
            out_specs=pl.BlockSpec((nb, C_out, t), lambda i, j: (i, 0, j)),
        ),
        compiler_params=pltpu.CompilerParams(
            dimension_semantics=("parallel", "parallel"),
            vmem_limit_bytes=vmem_limit,
        ),
    )(x, wk, b)

    return out.reshape(N, C_out, H, W)


def _reference(x, weight, bias):
    w2d = weight.reshape(weight.shape[0], weight.shape[1])
    y = jnp.einsum("nchw,oc->nohw", x, w2d, precision=lax.Precision.HIGHEST)
    return y + bias[None, :, None, None]


if __name__ == "__main__":
    key = jax.random.PRNGKey(0)
    k_x, k_w, k_b, k_x2, k_x3, k_w3, k_b3 = jax.random.split(key, 7)

    # --- Test 1: tiny channels (exact VPU path), N-blocked, 16x16 map ------
    N, C_in, C_out, Hs, Ws = 2, 4, 3, 16, 16
    x = jax.random.normal(k_x, (N, C_in, Hs, Ws), dtype=jnp.float32)
    fan_in = C_in
    bound = 1.0 / (fan_in ** 0.5)
    weight = jax.random.uniform(k_w, (C_out, C_in, 1, 1), jnp.float32, -bound, bound)
    bias = jax.random.uniform(k_b, (C_out,), jnp.float32, -bound, bound)

    y = outconv_forward(x, weight, bias)
    jax.block_until_ready(y)
    y_ref = _reference(x, weight, bias)
    assert y.shape == (N, C_out, Hs, Ws)
    assert jnp.allclose(y, y_ref, atol=1e-5, rtol=1e-5)

    # --- Test 2: ragged H*W (130, not a multiple of 128) --------------------
    x2 = jax.random.normal(k_x2, (1, C_in, 10, 13), dtype=jnp.float32)
    y2 = outconv_forward(x2, weight, bias)
    jax.block_until_ready(y2)
    y2_ref = _reference(x2, weight, bias)
    assert y2.shape == (1, C_out, 10, 13)
    assert jnp.allclose(y2, y2_ref, atol=1e-5, rtol=1e-5)

    # --- Test 3: larger channels -> default-precision MXU path --------------
    C_in3, C_out3 = 32, 8
    x3 = jax.random.normal(k_x3, (2, C_in3, 8, 8), dtype=jnp.float32)
    bound3 = 1.0 / (C_in3 ** 0.5)
    weight3 = jax.random.uniform(k_w3, (C_out3, C_in3, 1, 1), jnp.float32, -bound3, bound3)
    bias3 = jax.random.uniform(k_b3, (C_out3,), jnp.float32, -bound3, bound3)
    y3 = outconv_forward(x3, weight3, bias3)
    jax.block_until_ready(y3)
    y3_ref = _reference(x3, weight3, bias3)
    assert y3.shape == (2, C_out3, 8, 8)
    # Default MXU precision (bf16 passes) vs f32 reference -> looser tolerance.
    assert jnp.allclose(y3, y3_ref, atol=3e-2, rtol=3e-2)

    print("KERNEL_OK")
</pallas_src>

<mosaic_0001>
module attributes {stable_mosaic.version = 11 : i64} {
  func.func @_outconv_kernel(%arg0: i32, %arg1: i32, %arg2: memref<2x4x128xf32, #tpu.memory_space<vmem>>, %arg3: memref<4x3x1xf32, #tpu.memory_space<vmem>>, %arg4: memref<3x1xf32, #tpu.memory_space<vmem>>, %arg5: memref<2x3x128xf32, #tpu.memory_space<vmem>>) attributes {dimension_semantics = [#tpu.dimension_semantics<parallel>, #tpu.dimension_semantics<parallel>], iteration_bounds = array<i64: 1, 2>, scalar_prefetch = 0 : i64, scratch_operands = 0 : i64, tpu.core_type = #tpu.core_type<tc>, window_params = [{transform_indices = @transform_0, window_bounds = array<i64: 2, 4, 128>}, {pipeline_mode = #tpu.pipeline_mode<synchronous>, transform_indices = @transform_1, window_bounds = array<i64: 4, 3, 1>}, {pipeline_mode = #tpu.pipeline_mode<synchronous>, transform_indices = @transform_2, window_bounds = array<i64: 3, 1>}, {transform_indices = @transform_3, window_bounds = array<i64: 2, 3, 128>}]} {
    %c0 = arith.constant 0 : index
    %c0_0 = arith.constant 0 : index
    %0 = vector.load %arg4[%c0, %c0_0] : memref<3x1xf32, #tpu.memory_space<vmem>>, vector<3x1xf32>
    %c0_1 = arith.constant 0 : index
    %c0_2 = arith.constant 0 : index
    %c0_3 = arith.constant 0 : index
    %1 = vector.load %arg3[%c0_1, %c0_2, %c0_3] : memref<4x3x1xf32, #tpu.memory_space<vmem>>, vector<4x3x1xf32>
    %c0_4 = arith.constant 0 : index
    %c0_5 = arith.constant 0 : index
    %c0_6 = arith.constant 0 : index
    %2 = vector.load %arg2[%c0_4, %c0_5, %c0_6] : memref<2x4x128xf32, #tpu.memory_space<vmem>>, vector<1x4x128xf32>
    %3 = vector.shape_cast %2 : vector<1x4x128xf32> to vector<4x128xf32>
    %4 = vector.extract_strided_slice %1 {offsets = [0, 0, 0], sizes = [1, 3, 1], strides = [1, 1, 1]} : vector<4x3x1xf32> to vector<1x3x1xf32>
    %5 = vector.shape_cast %4 : vector<1x3x1xf32> to vector<3x1xf32>
    %6 = vector.extract_strided_slice %3 {offsets = [0, 0], sizes = [1, 128], strides = [1, 1]} : vector<4x128xf32> to vector<1x128xf32>
    %7 = vector.broadcast %5 : vector<3x1xf32> to vector<3x128xf32>
    %8 = vector.broadcast %6 : vector<1x128xf32> to vector<3x128xf32>
    %9 = arith.mulf %7, %8 : vector<3x128xf32>
    %10 = vector.broadcast %0 : vector<3x1xf32> to vector<3x128xf32>
    %11 = arith.addf %10, %9 : vector<3x128xf32>
    %12 = vector.extract_strided_slice %1 {offsets = [1, 0, 0], sizes = [1, 3, 1], strides = [1, 1, 1]} : vector<4x3x1xf32> to vector<1x3x1xf32>
    %13 = vector.shape_cast %12 : vector<1x3x1xf32> to vector<3x1xf32>
    %14 = vector.extract_strided_slice %3 {offsets = [1, 0], sizes = [1, 128], strides = [1, 1]} : vector<4x128xf32> to vector<1x128xf32>
    %15 = vector.broadcast %13 : vector<3x1xf32> to vector<3x128xf32>
    %16 = vector.broadcast %14 : vector<1x128xf32> to vector<3x128xf32>
    %17 = arith.mulf %15, %16 : vector<3x128xf32>
    %18 = arith.addf %11, %17 : vector<3x128xf32>
    %19 = vector.extract_strided_slice %1 {offsets = [2, 0, 0], sizes = [1, 3, 1], strides = [1, 1, 1]} : vector<4x3x1xf32> to vector<1x3x1xf32>
    %20 = vector.shape_cast %19 : vector<1x3x1xf32> to vector<3x1xf32>
    %21 = vector.extract_strided_slice %3 {offsets = [2, 0], sizes = [1, 128], strides = [1, 1]} : vector<4x128xf32> to vector<1x128xf32>
    %22 = vector.broadcast %20 : vector<3x1xf32> to vector<3x128xf32>
    %23 = vector.broadcast %21 : vector<1x128xf32> to vector<3x128xf32>
    %24 = arith.mulf %22, %23 : vector<3x128xf32>
    %25 = arith.addf %18, %24 : vector<3x128xf32>
    %26 = vector.extract_strided_slice %1 {offsets = [3, 0, 0], sizes = [1, 3, 1], strides = [1, 1, 1]} : vector<4x3x1xf32> to vector<1x3x1xf32>
    %27 = vector.shape_cast %26 : vector<1x3x1xf32> to vector<3x1xf32>
    %28 = vector.extract_strided_slice %3 {offsets = [3, 0], sizes = [1, 128], strides = [1, 1]} : vector<4x128xf32> to vector<1x128xf32>
    %29 = vector.broadcast %27 : vector<3x1xf32> to vector<3x128xf32>
    %30 = vector.broadcast %28 : vector<1x128xf32> to vector<3x128xf32>
    %31 = arith.mulf %29, %30 : vector<3x128xf32>
    %32 = arith.addf %25, %31 : vector<3x128xf32>
    %c0_7 = arith.constant 0 : index
    %c0_8 = arith.constant 0 : index
    %c0_9 = arith.constant 0 : index
    %33 = vector.load %arg5[%c0_7, %c0_8, %c0_9] : memref<2x3x128xf32, #tpu.memory_space<vmem>>, vector<1x3x128xf32>
    %34 = vector.shape_cast %33 : vector<1x3x128xf32> to vector<3x128xf32>
    %35 = vector.shape_cast %32 : vector<3x128xf32> to vector<1x3x128xf32>
    tpu.vector_store %arg5[%c0_7, %c0_8, %c0_9], %35 {strides = array<i32>} : memref<2x3x128xf32, #tpu.memory_space<vmem>>, vector<1x3x128xf32>,
    %c1 = arith.constant 1 : index
    %c0_10 = arith.constant 0 : index
    %c0_11 = arith.constant 0 : index
    %36 = vector.load %arg2[%c1, %c0_10, %c0_11] : memref<2x4x128xf32, #tpu.memory_space<vmem>>, vector<1x4x128xf32>
    %37 = vector.shape_cast %36 : vector<1x4x128xf32> to vector<4x128xf32>
    %38 = vector.extract_strided_slice %1 {offsets = [0, 0, 0], sizes = [1, 3, 1], strides = [1, 1, 1]} : vector<4x3x1xf32> to vector<1x3x1xf32>
    %39 = vector.shape_cast %38 : vector<1x3x1xf32> to vector<3x1xf32>
    %40 = vector.extract_strided_slice %37 {offsets = [0, 0], sizes = [1, 128], strides = [1, 1]} : vector<4x128xf32> to vector<1x128xf32>
    %41 = vector.broadcast %39 : vector<3x1xf32> to vector<3x128xf32>
    %42 = vector.broadcast %40 : vector<1x128xf32> to vector<3x128xf32>
    %43 = arith.mulf %41, %42 : vector<3x128xf32>
    %44 = vector.broadcast %0 : vector<3x1xf32> to vector<3x128xf32>
    %45 = arith.addf %44, %43 : vector<3x128xf32>
    %46 = vector.extract_strided_slice %1 {offsets = [1, 0, 0], sizes = [1, 3, 1], strides = [1, 1, 1]} : vector<4x3x1xf32> to vector<1x3x1xf32>
    %47 = vector.shape_cast %46 : vector<1x3x1xf32> to vector<3x1xf32>
    %48 = vector.extract_strided_slice %37 {offsets = [1, 0], sizes = [1, 128], strides = [1, 1]} : vector<4x128xf32> to vector<1x128xf32>
    %49 = vector.broadcast %47 : vector<3x1xf32> to vector<3x128xf32>
    %50 = vector.broadcast %48 : vector<1x128xf32> to vector<3x128xf32>
    %51 = arith.mulf %49, %50 : vector<3x128xf32>
    %52 = arith.addf %45, %51 : vector<3x128xf32>
    %53 = vector.extract_strided_slice %1 {offsets = [2, 0, 0], sizes = [1, 3, 1], strides = [1, 1, 1]} : vector<4x3x1xf32> to vector<1x3x1xf32>
    %54 = vector.shape_cast %53 : vector<1x3x1xf32> to vector<3x1xf32>
    %55 = vector.extract_strided_slice %37 {offsets = [2, 0], sizes = [1, 128], strides = [1, 1]} : vector<4x128xf32> to vector<1x128xf32>
    %56 = vector.broadcast %54 : vector<3x1xf32> to vector<3x128xf32>
    %57 = vector.broadcast %55 : vector<1x128xf32> to vector<3x128xf32>
    %58 = arith.mulf %56, %57 : vector<3x128xf32>
    %59 = arith.addf %52, %58 : vector<3x128xf32>
    %60 = vector.extract_strided_slice %1 {offsets = [3, 0, 0], sizes = [1, 3, 1], strides = [1, 1, 1]} : vector<4x3x1xf32> to vector<1x3x1xf32>
    %61 = vector.shape_cast %60 : vector<1x3x1xf32> to vector<3x1xf32>
    %62 = vector.extract_strided_slice %37 {offsets = [3, 0], sizes = [1, 128], strides = [1, 1]} : vector<4x128xf32> to vector<1x128xf32>
    %63 = vector.broadcast %61 : vector<3x1xf32> to vector<3x128xf32>
    %64 = vector.broadcast %62 : vector<1x128xf32> to vector<3x128xf32>
    %65 = arith.mulf %63, %64 : vector<3x128xf32>
    %66 = arith.addf %59, %65 : vector<3x128xf32>
    %c1_12 = arith.constant 1 : index
    %c0_13 = arith.constant 0 : index
    %c0_14 = arith.constant 0 : index
    %67 = vector.load %arg5[%c1_12, %c0_13, %c0_14] : memref<2x3x128xf32, #tpu.memory_space<vmem>>, vector<1x3x128xf32>
    %68 = vector.shape_cast %67 : vector<1x3x128xf32> to vector<3x128xf32>
    %69 = vector.shape_cast %66 : vector<3x128xf32> to vector<1x3x128xf32>
    tpu.vector_store %arg5[%c1_12, %c0_13, %c0_14], %69 {strides = array<i32>} : memref<2x3x128xf32, #tpu.memory_space<vmem>>, vector<1x3x128xf32>,
    return
  }
  func.func @transform_0(%arg0: i32, %arg1: i32) -> (i32, i32, i32) {
    %c0_i32 = arith.constant 0 : i32
    %c0_i32_0 = arith.constant 0 : i32
    return %arg0, %c0_i32, %arg1 : i32, i32, i32
  }
  func.func @transform_1(%arg0: i32, %arg1: i32) -> (i32, i32, i32) {
    %c0_i32 = arith.constant 0 : i32
    %c0_i32_0 = arith.constant 0 : i32
    %c0_i32_1 = arith.constant 0 : i32
    %c0_i32_2 = arith.constant 0 : i32
    return %c0_i32, %c0_i32_0, %c0_i32_1 : i32, i32, i32
  }
  func.func @transform_2(%arg0: i32, %arg1: i32) -> (i32, i32) {
    %c0_i32 = arith.constant 0 : i32
    %c0_i32_0 = arith.constant 0 : i32
    %c0_i32_1 = arith.constant 0 : i32
    return %c0_i32, %c0_i32_0 : i32, i32
  }
  func.func @transform_3(%arg0: i32, %arg1: i32) -> (i32, i32, i32) {
    %c0_i32 = arith.constant 0 : i32
    %c0_i32_0 = arith.constant 0 : i32
    return %arg0, %c0_i32, %arg1 : i32, i32, i32
  }
}

</mosaic_0001>

<bundles_post_ra>
// kernel: tpu_custom_call.1
= control target key start
LH: loop header
LB: loop body
LE: loop exit
PB: predicated region body
PF: predicated region fallthrough
CT: control target
= control target key end

     0   :  { %s539_s12 = smov 0   ;;  %s541_s13 = smov 0   ;;  %s630_s0 = inlined_call_operand.vmem [shape: f32[2,4,256], index: 0, kind: input, shape index: {}]   ;;  %s631_s1 = inlined_call_operand.vmem [shape: f32[4,3,1], index: 1, kind: input, shape index: {}]   ;;  %s632_s2 = inlined_call_operand.vmem [shape: f32[3,1], index: 2, kind: input, shape index: {}]   ;;  %s633_s3 = inlined_call_operand.vmem [shape: f32[2,3,256], index: 3, kind: output, shape index: {}]  }
   0x1   :  { %s543_s14 = smov 0   ;;  %s545_s15 = smov 0  }
   0x2   :  { %s547_s16 = smov 0  }
   0x3 LB: > { %s22_s17 = sadd.s32 1, %s512_s15  ;;  %s419_s18 = sadd.s32 4294967295, %s516_s16   ;;  %s516_s16 = sphi %s547_s16, %s13_s16   ;;  %s512_s15 = sphi %s545_s15, %s638_s15   ;;  %s508_s14 = sphi %s543_s14, %s637_s14   ;;  %s504_s13 = sphi %s541_s13, %s636_s13   ;;  %s500_s12 = sphi %s539_s12, %s635_s12  }
   0x4   : > { %p23_p0 = scmp.ge.s32.totalorder %s22_s17, 2  ;;  %p41_p1 = scmp.ne.s32.totalorder %s504_s13, %s500_s12 }
   0x5   : > { %p42_p2 = scmp.eq.s32.totalorder %s516_s16, 0  ;;  %p115_p4 = scmp.eq.s32.totalorder %s419_s18, 1 }
   0x6   : > { %s640_s17 = smov (%p23_p0, %s22_s17), 0  ;;  %s34_s20 = sadd.s32 1, %s504_s13 }
   0x7   : > { %p43_p3 = por %p42_p2, %p41_p1  ;;  %s30_s19 = ssub.s32 %s512_s15, %s640_s17 }
   0x8   : > { %p32_p5 = scmp.eq.s32.totalorder %s30_s19, 0  ;;  %p574_p6 = por %p115_p4, %p41_p1 }
   0x9   : > { %p422_p7 = scmp.ge.s32.totalorder %s516_s16, 2 }
   0xa   : > { %s579_s22 = scalar_select %p32_p5, %s504_s13, %s34_s20  }
   0xb   : > { %143 = sbr.rel (%p422_p7) target bundleno = 22 (0x16), region = 24 }
  0x10   : > { %146 = sbr.rel (!%p43_p3) target bundleno = 22 (0x16), region = 28  ;;  %s148_s23 = sand.u32 (%p43_p3), 1, %s504_s13  }
  0x11   : > { %s424_s24 = sshll.u32 (%p43_p3), %s512_s15, 2  ;;  %s423_s25 = sshll.u32 (%p43_p3), %s148_s23, 3 }
  0x12   : > { %s155_s28 = scalar_lea.vmem (%p43_p3), %s630_s0, %s424_s24  ;;  %s150_s29 = scalar_lea.vmem (%p43_p3), [#allocation2], %s423_s25 }
  0x13   : > { %v172_v0 = vld [vmem:[%s155_s28] sm:$0xf] (%p43_p3)  ;;  %v174_v1 = vld [vmem:[%s155_s28 + $0x8] sm:$0xf] (%p43_p3) }
  0x14   : > { %173 = vst [vmem:[%s150_s29] sm:$0xf] (%p43_p3), %v172_v0 }
  0x15   : > { %175 = vst [vmem:[%s150_s29 + $0x4] sm:$0xf] %v174_v1 }
  0x16 PF: > { %p425_p8 = scmp.ge.s32.totalorder %s516_s16, 1  ;;  %p202_p9 = scmp.lt.s32.totalorder %s516_s16, 3 }
  0x18   : > { %p203_p10 = pnand %p425_p8, %p202_p9 }
  0x19   : > { %s209_s19 = sand.u32 (!%p203_p10), 1, %s500_s12  }
  0x1a   : > { %206 = sbr.rel (%p203_p10) target bundleno = 174 (0xae), region = 69  ;;  %s605_s20 = sshll.u32 (!%p203_p10), %s209_s19, 3 }
  0x1b   : > { %s211_s23 = scalar_lea.vmem (!%p203_p10), [#allocation2], %s605_s20  ;;  %s230_s12 = scalar_lea.vmem (!%p203_p10), [#allocation3], %s605_s20 }
  0x1f   : > { %v235_v2 = vld [vmem:[%s631_s1 + $0x4] sm:$0x7]  ;;  %v234_v3 = vld [vmem:[%s631_s1] sm:$0x7]  ;;  %v518_v4 = vmov 0   ;;  %s431_s24 = sshll.u32 (%p574_p6), %s508_s14, 2 }
  0x20   : > { %476 = vset.pattern.permute.xlu1 %v518_v4  ;;  %475 = vset.pattern.permute.xlu0 %v518_v4  ;;  %v237_v5 = vld [vmem:[%s631_s1 + $0xc] sm:$0x7]  ;;  %v236_v6 = vld [vmem:[%s631_s1 + $0x8] sm:$0x7]  ;;  %v233_v7 = vld [vmem:[%s632_s2] sm:$0x7]  ;;  %s304_s27 = scalar_lea.vmem (%p574_p6), %s633_s3, %s431_s24 }
  0x21   : > { %254 = vperm.xlu1 %476, %v235_v2   ;;  %241 = vperm.xlu0 %475, %v234_v3   ;;  %v238_v9 = vld [vmem:[%s211_s23] sm:$0xf]  ;;  %v428_v10 = vld [vmem:[%s211_s23 + $0x4] sm:$0xf] }
  0x22   : > { %477 = vset.pattern.permute.xlu2 %v518_v4  ;;  %v244_v12 = vperm.slane %v238_v9, 0  ;;  %v279_v13 = vperm.slane %v428_v10, 0  ;;  %v257_v14 = vperm.slane %v238_v9, 1  ;;  %v282_v15 = vperm.slane %v428_v10, 1 }
  0x23   : > { %270 = vperm.xlu2 %477, %v237_v5   ;;  %v273_v16 = vperm.slane %v238_v9, 3  ;;  %v288_v17 = vperm.slane %v428_v10, 3  ;;  %v265_v20 = vperm.slane %v238_v9, 2  ;;  %v285_v21 = vperm.slane %v428_v10, 2 }
  0x29   : > { %262 = vperm.xlu1 %476, %v236_v6   ;;  %248 = vperm.xlu0 %475, %v233_v7  }
  0x7d   : > { %v271_v22 = vpop.permute.xlu2 %270 }
  0x7e   : > { %v274_v29 = vmul.f32 %v273_v16, %v271_v22  ;;  %v289_v30 = vmul.f32 %v288_v17, %v271_v22 }
  0x93   : > { %v255_v8 = vpop.permute.xlu1 %254  ;;  %v242_v11 = vpop.permute.xlu0 %241 }
  0x94   : > { %v245_v18 = vmul.f32 %v244_v12, %v242_v11  ;;  %v280_v19 = vmul.f32 %v279_v13, %v242_v11  ;;  %v258_v25 = vmul.f32 %v257_v14, %v255_v8  ;;  %v283_v26 = vmul.f32 %v282_v15, %v255_v8 }
  0x9b   : > { %v263_v23 = vpop.permute.xlu1 %262  ;;  %v249_v24 = vpop.permute.xlu0 %248 }
  0x9c   : > { %v251_v27 = vadd.f32 %v249_v24, %v245_v18  ;;  %v281_v28 = vadd.f32 %v280_v19, %v249_v24  ;;  %v266_v31 = vmul.f32 %v265_v20, %v263_v23  ;;  %v286_v32 = vmul.f32 %v285_v21, %v263_v23 }
  0x9e   : > { %v259_v33 = vadd.f32 %v258_v25, %v251_v27  ;;  %v284_v34 = vadd.f32 %v283_v26, %v281_v28 }
  0xa0   : > { %v267_v35 = vadd.f32 %v266_v31, %v259_v33  ;;  %v287_v36 = vadd.f32 %v286_v32, %v284_v34 }
  0xa1   : > { %299 = sbr.rel (!%p574_p6) target bundleno = 174 (0xae), region = 77 }
  0xa2   : > { %v275_v37 = vadd.f32 %v274_v29, %v267_v35  ;;  %v290_v38 = vadd.f32 %v289_v30, %v287_v36 }
  0xa4   : > { %276 = vst [vmem:[%s230_s12] sm:$0x7] %v275_v37 }
  0xa5   : > { %429 = vst [vmem:[%s230_s12 + $0x4] sm:$0x7] %v290_v38 }
  0xab   : > { %v321_v39 = vld [vmem:[%s230_s12] sm:$0xf] }
  0xac   : > { %v323_v40 = vld [vmem:[%s230_s12 + $0x4] sm:$0xf]  ;;  %322 = vst [vmem:[%s304_s27] sm:$0xf] %v321_v39 }
  0xad   : > { %324 = vst [vmem:[%s304_s27 + $0x8] sm:$0xf] %v323_v40 }
  0xae PF: > { %s13_s16 = sadd.s32 1, %s516_s16   ;;  %s635_s12 = smov %s504_s13 }
  0xaf   : > { %p10_p11 = scmp.ge.s32.totalorder %s13_s16, 4   ;;  %s636_s13 = smov %s579_s22 }
  0xb0   : > { %s637_s14 = smov %s512_s15  ;;  %s638_s15 = smov %s640_s17 }
  0xb1   :  { %12 = sbr.rel (!%p10_p11) target bundleno = 3 (0x3), region = 151 }

</bundles_post_ra>
